<compile_context>
chip_gen: v6e
topology: v6e:2x2x1
jax: 0.10.0
libtpu: 0.0.40
codegen_flags: <defaults>
</compile_context>

<pallas_src>
import jax
import jax.numpy as jnp
from jax.experimental import pallas as pl
from jax.experimental.pallas import tpu as pltpu


def _round_up(x, m):
    return (x + m - 1) // m * m


def _pad_gate_cols(w, H, Hp):
    """(rows, 4H) -> (rows, 4Hp): each of the 4 gate blocks padded to Hp lanes."""
    rows = w.shape[0]
    w4 = w.reshape(rows, 4, H)
    out = jnp.zeros((rows, 4, Hp), w.dtype).at[:, :, :H].set(w4)
    return out.reshape(rows, 4 * Hp)


def _make_lstm_kernel(T, TC, Hp, compute_dtype):
    """Kernel over grid=(num_chunks,); each grid step runs TC timesteps."""
    needs_tail_mask = (T % TC) != 0          # static: mask only if padded steps exist

    def kernel(gx_ref, whh_hbm, wlin_ref, blin_ref, out_ref,
               whh_vmem, h_ref, c_ref, dma_sem):
        c_idx = pl.program_id(0)

        @pl.when(c_idx == 0)
        def _init():
            # Copy W_hh^T HBM -> VMEM exactly once; overlap with h/c zero-init.
            cp = pltpu.make_async_copy(whh_hbm, whh_vmem, dma_sem)
            cp.start()
            h_ref[...] = jnp.zeros_like(h_ref)
            c_ref[...] = jnp.zeros_like(c_ref)
            cp.wait()

        def step(j, carry):
            h_prev = h_ref[...]                      # (B, Hp) f32
            c_prev = c_ref[...]                      # (B, Hp) f32

            # Recurrent projection on the MXU (compute_dtype operands, f32
            # accumulation) plus the precomputed f32 input projection + bias.
            gates = (jnp.dot(h_prev.astype(compute_dtype), whh_vmem[...],
                             preferred_element_type=jnp.float32)
                     + gx_ref[j])                                  # (B, 4Hp) f32

            # Lane-aligned static gate slices (Hp is a multiple of 128).
            i_g = jax.nn.sigmoid(gates[:, 0 * Hp:1 * Hp])
            f_g = jax.nn.sigmoid(gates[:, 1 * Hp:2 * Hp])
            g_g = jnp.tanh(gates[:, 2 * Hp:3 * Hp])
            o_g = jax.nn.sigmoid(gates[:, 3 * Hp:4 * Hp])

            c_new = f_g * c_prev + i_g * g_g
            h_new = o_g * jnp.tanh(c_new)

            if needs_tail_mask:
                # Mask padded tail steps (only possible in the last chunk).
                valid = (c_idx * TC + j) < T
                c_ref[...] = jnp.where(valid, c_new, c_prev)
                h_ref[...] = jnp.where(valid, h_new, h_prev)
            else:
                c_ref[...] = c_new
                h_ref[...] = h_new
            return carry

        jax.lax.fori_loop(0, TC, step, 0, unroll=True)

        @pl.when(c_idx == pl.num_programs(0) - 1)
        def _finish():
            # Fused final linear projection on the last hidden state (f32).
            out_ref[...] = (jnp.dot(h_ref[...], wlin_ref[...],
                                    preferred_element_type=jnp.float32)
                            + blin_ref[...])

    return kernel


def lstm_forward(x, w_ih, w_hh, b_ih, b_hh, w_lin, b_lin, *,
                 compute_dtype=jnp.bfloat16, time_chunk=8):
    """x: (T, B, I) float32. Returns (B, output_size) float32."""
    T, B, I = x.shape
    H = w_hh.shape[1]
    O = w_lin.shape[0]
    Hp = _round_up(H, 128)                           # lane-aligned hidden size

    TC = max(1, min(time_chunk, T))
    num_chunks = (T + TC - 1) // TC
    Tp = num_chunks * TC

    # --- Hoisted, non-recurrent input projection: one GEMM over all T*B rows.
    wih_t = _pad_gate_cols(w_ih.T, H, Hp)                            # (I, 4Hp)
    bias = _pad_gate_cols((b_ih + b_hh).reshape(1, 4 * H), H, Hp)    # (1, 4Hp)
    gx = jnp.einsum('tbi,ig->tbg', x, wih_t) + bias                  # (T, B, 4Hp) f32
    if Tp > T:
        gx = jnp.concatenate(
            [gx, jnp.zeros((Tp - T, B, 4 * Hp), gx.dtype)], axis=0)
    gx = gx.astype(jnp.float32)   # kept f32: DMA is hidden, keeps gate adds exact

    # --- Recurrent weight: gate-padded cols + zero-padded rows, MXU dtype.
    whh_t = _pad_ate = _pad_gate_cols(w_hh.T, H, Hp)                 # (H, 4Hp)
    whh_t = jnp.zeros((Hp, 4 * Hp), whh_t.dtype).at[:H, :].set(whh_t)
    whh_t = whh_t.astype(compute_dtype)                              # (Hp, 4Hp)

    # --- Final linear (tiny, kept f32). Padded rows are zero -> inert.
    wlin_t = jnp.zeros((Hp, O), jnp.float32).at[:H, :].set(w_lin.T)  # (Hp, O)
    blin = b_lin.reshape(1, O).astype(jnp.float32)                   # (1, O)

    # VMEM budget: double-buffered gx blocks + single-resident W_hh + state.
    cbytes = jnp.dtype(compute_dtype).itemsize
    vmem_needed = (2 * TC * B * 4 * Hp * 4           # gx pipeline buffers (f32)
                   + Hp * 4 * Hp * cbytes            # resident W_hh scratch
                   + 2 * (Hp * O + O) * 4            # wlin / blin buffers
                   + 2 * B * Hp * 4                  # h, c state
                   + B * O * 4)                      # output block
    vmem_limit = int(min(max(2 * vmem_needed, 32 * 1024 * 1024),
                         64 * 1024 * 1024))

    grid_spec = pltpu.PrefetchScalarGridSpec(
        num_scalar_prefetch=0,
        grid=(num_chunks,),
        in_specs=[
            pl.BlockSpec((TC, B, 4 * Hp), lambda c: (c, 0, 0)),  # gx (pipelined)
            pl.BlockSpec(memory_space=pl.ANY),                   # W_hh^T (HBM)
            pl.BlockSpec((Hp, O), lambda c: (0, 0)),             # W_lin^T
            pl.BlockSpec((1, O), lambda c: (0, 0)),              # b_lin
        ],
        out_specs=pl.BlockSpec((B, O), lambda c: (0, 0)),
        scratch_shapes=[
            pltpu.VMEM((Hp, 4 * Hp), compute_dtype),  # resident W_hh (1 copy)
            pltpu.VMEM((B, Hp), jnp.float32),         # h state (f32)
            pltpu.VMEM((B, Hp), jnp.float32),         # c state (f32)
            pltpu.SemaphoreType.DMA(()),              # weight-copy semaphore
        ],
    )

    return pl.pallas_call(
        _make_lstm_kernel(T, TC, Hp, compute_dtype),
        out_shape=jax.ShapeDtypeStruct((B, O), jnp.float32),
        grid_spec=grid_spec,
        compiler_params=pltpu.CompilerParams(
            dimension_semantics=("arbitrary",),
            vmem_limit_bytes=vmem_limit),
    )(gx, whh_t, wlin_t, blin)


def lstm_reference(x, w_ih, w_hh, b_ih, b_hh, w_lin, b_lin):
    """Pure-JAX reference matching torch.nn.LSTM + Linear semantics."""
    T, B, I = x.shape
    H = w_hh.shape[1]

    def step(carry, x_t):
        h, c = carry
        gates = x_t @ w_ih.T + b_ih + h @ w_hh.T + b_hh
        i = jax.nn.sigmoid(gates[:, 0 * H:1 * H])
        f = jax.nn.sigmoid(gates[:, 1 * H:2 * H])
        g = jnp.tanh(gates[:, 2 * H:3 * H])
        o = jax.nn.sigmoid(gates[:, 3 * H:4 * H])
        c_new = f * c + i * g
        h_new = o * jnp.tanh(c_new)
        return (h_new, c_new), h_new

    init = (jnp.zeros((B, H), jnp.float32), jnp.zeros((B, H), jnp.float32))
    (_, _), hs = jax.lax.scan(step, init, x)
    return hs[-1] @ w_lin.T + b_lin     # predictions[-1] == linear(h_T)


if __name__ == "__main__":
    # Small deterministic config (module default hidden=1500; use 32 for test).
    T, B, I, H, O = 8, 2, 4, 32, 1

    key = jax.random.PRNGKey(0)
    keys = jax.random.split(key, 7)
    bound = 1.0 / jnp.sqrt(jnp.float32(H))   # PyTorch-style uniform init range

    x = jax.random.normal(keys[0], (T, B, I), dtype=jnp.float32)
    w_ih = jax.random.uniform(keys[1], (4 * H, I), jnp.float32, -bound, bound)
    w_hh = jax.random.uniform(keys[2], (4 * H, H), jnp.float32, -bound, bound)
    b_ih = jax.random.uniform(keys[3], (4 * H,), jnp.float32, -bound, bound)
    b_hh = jax.random.uniform(keys[4], (4 * H,), jnp.float32, -bound, bound)
    w_lin = jax.random.uniform(keys[5], (O, H), jnp.float32, -bound, bound)
    b_lin = jax.random.uniform(keys[6], (O,), jnp.float32, -bound, bound)

    ref = lstm_reference(x, w_ih, w_hh, b_ih, b_hh, w_lin, b_lin)

    # Exact path: f32 operands, even time chunking (bit-faithful to the module).
    out_f32 = lstm_forward(x, w_ih, w_hh, b_ih, b_hh, w_lin, b_lin,
                           compute_dtype=jnp.float32, time_chunk=4)
    out_f32 = jax.block_until_ready(out_f32)
    assert out_f32.shape == (B, O), out_f32.shape
    assert jnp.allclose(out_f32, ref, atol=1e-5, rtol=1e-5), (out_f32, ref)

    # Fast path: bf16 MXU operands (f32 state/accumulation/gx); uneven chunking
    # (TC=3 for T=8) also exercises the padded-tail-step masking.
    out_bf16 = lstm_forward(x, w_ih, w_hh, b_ih, b_hh, w_lin, b_lin,
                            compute_dtype=jnp.bfloat16, time_chunk=3)
    out_bf16 = jax.block_until_ready(out_bf16)
    assert jnp.allclose(out_bf16, ref, atol=3e-2, rtol=3e-2), (out_bf16, ref)

    print("KERNEL_OK")
</pallas_src>

<mosaic_0001>
module attributes {stable_mosaic.version = 11 : i64} {
  func.func @kernel(%arg0: i32, %arg1: memref<4x2x512xf32, #tpu.memory_space<vmem>>, %arg2: memref<128x512xf32, #tpu.memory_space<any>>, %arg3: memref<128x1xf32, #tpu.memory_space<vmem>>, %arg4: memref<1x1xf32, #tpu.memory_space<vmem>>, %arg5: memref<2x1xf32, #tpu.memory_space<vmem>>, %arg6: memref<128x512xf32, #tpu.memory_space<vmem>>, %arg7: memref<2x128xf32, #tpu.memory_space<vmem>>, %arg8: memref<2x128xf32, #tpu.memory_space<vmem>>, %arg9: memref<!tpu.dma_semaphore, #tpu.memory_space<semaphore_mem>>) attributes {dimension_semantics = [#tpu.dimension_semantics<arbitrary>], iteration_bounds = array<i64: 2>, scalar_prefetch = 0 : i64, scratch_operands = 4 : i64, tpu.core_type = #tpu.core_type<tc>, window_params = [{transform_indices = @transform_0, window_bounds = array<i64: 4, 2, 512>}, {}, {pipeline_mode = #tpu.pipeline_mode<synchronous>, transform_indices = @transform_2, window_bounds = array<i64: 128, 1>}, {pipeline_mode = #tpu.pipeline_mode<synchronous>, transform_indices = @transform_3, window_bounds = array<i64: 1, 1>}, {pipeline_mode = #tpu.pipeline_mode<synchronous>, transform_indices = @transform_4, window_bounds = array<i64: 2, 1>}]} {
    %c0_i32 = arith.constant 0 : i32
    %0 = arith.cmpi eq, %arg0, %c0_i32 : i32
    %1 = arith.extui %0 : i1 to i32
    %c0_i32_0 = arith.constant 0 : i32
    %2 = arith.cmpi ne, %1, %c0_i32_0 : i32
    scf.if %2 {
      tpu.enqueue_dma source(%arg2 : memref<128x512xf32, #tpu.memory_space<any>>) target(%arg6 : memref<128x512xf32, #tpu.memory_space<vmem>>) target_semaphore(%arg9 : memref<!tpu.dma_semaphore, #tpu.memory_space<semaphore_mem>>)
      %cst_66 = arith.constant 0.000000e+00 : f32
      %146 = vector.broadcast %cst_66 : f32 to vector<2x128xf32>
      %c0_67 = arith.constant 0 : index
      %c0_68 = arith.constant 0 : index
      %147 = vector.load %arg7[%c0_67, %c0_68] : memref<2x128xf32, #tpu.memory_space<vmem>>, vector<2x128xf32>
      tpu.vector_store %arg7[%c0_67, %c0_68], %146 {strides = array<i32>} : memref<2x128xf32, #tpu.memory_space<vmem>>, vector<2x128xf32>,
      %cst_69 = arith.constant 0.000000e+00 : f32
      %148 = vector.broadcast %cst_69 : f32 to vector<2x128xf32>
      %c0_70 = arith.constant 0 : index
      %c0_71 = arith.constant 0 : index
      %149 = vector.load %arg8[%c0_70, %c0_71] : memref<2x128xf32, #tpu.memory_space<vmem>>, vector<2x128xf32>
      tpu.vector_store %arg8[%c0_70, %c0_71], %148 {strides = array<i32>} : memref<2x128xf32, #tpu.memory_space<vmem>>, vector<2x128xf32>,
      tpu.wait_dma2 semaphore(%arg9 : memref<!tpu.dma_semaphore, #tpu.memory_space<semaphore_mem>>) src(%arg2 : memref<128x512xf32, #tpu.memory_space<any>>) dst(%arg6 : memref<128x512xf32, #tpu.memory_space<vmem>>)
    } else {
    }
    %c0_i32_1 = arith.constant 0 : i32
    %c0 = arith.constant 0 : index
    %c0_2 = arith.constant 0 : index
    %3 = vector.load %arg7[%c0, %c0_2] : memref<2x128xf32, #tpu.memory_space<vmem>>, vector<2x128xf32>
    %c0_3 = arith.constant 0 : index
    %c0_4 = arith.constant 0 : index
    %4 = vector.load %arg8[%c0_3, %c0_4] : memref<2x128xf32, #tpu.memory_space<vmem>>, vector<2x128xf32>
    %c0_5 = arith.constant 0 : index
    %c0_6 = arith.constant 0 : index
    %5 = vector.load %arg6[%c0_5, %c0_6] : memref<128x512xf32, #tpu.memory_space<vmem>>, vector<128x512xf32>
    %cst = arith.constant dense<0.000000e+00> : vector<2x512xf32>
    %6 = tpu.matmul %3, %5, %cst {dimension_numbers = #tpu.dot_dimension_numbers<[1], [0], [0], [1], [0, 0, 1, 1], [], []>} : vector<2x128xf32>, vector<128x512xf32>, vector<2x512xf32> -> vector<2x512xf32>
    %7 = arith.index_cast %c0_i32_1 : i32 to index
    %c0_7 = arith.constant 0 : index
    %c0_8 = arith.constant 0 : index
    %8 = vector.load %arg1[%7, %c0_7, %c0_8] : memref<4x2x512xf32, #tpu.memory_space<vmem>>, vector<1x2x512xf32>
    %9 = vector.shape_cast %8 : vector<1x2x512xf32> to vector<2x512xf32>
    %10 = arith.addf %6, %9 : vector<2x512xf32>
    %11 = vector.extract_strided_slice %10 {offsets = [0, 0], sizes = [2, 128], strides = [1, 1]} : vector<2x512xf32> to vector<2x128xf32>
    %12 = arith.negf %11 : vector<2x128xf32>
    %13 = math.exp %12 : vector<2x128xf32>
    %cst_9 = arith.constant 1.000000e+00 : f32
    %14 = vector.broadcast %cst_9 : f32 to vector<2x128xf32>
    %15 = arith.addf %14, %13 : vector<2x128xf32>
    %16 = arith.divf %14, %15 : vector<2x128xf32>
    %17 = vector.extract_strided_slice %10 {offsets = [0, 128], sizes = [2, 128], strides = [1, 1]} : vector<2x512xf32> to vector<2x128xf32>
    %18 = arith.negf %17 : vector<2x128xf32>
    %19 = math.exp %18 : vector<2x128xf32>
    %cst_10 = arith.constant 1.000000e+00 : f32
    %20 = vector.broadcast %cst_10 : f32 to vector<2x128xf32>
    %21 = arith.addf %20, %19 : vector<2x128xf32>
    %22 = arith.divf %20, %21 : vector<2x128xf32>
    %23 = vector.extract_strided_slice %10 {offsets = [0, 256], sizes = [2, 128], strides = [1, 1]} : vector<2x512xf32> to vector<2x128xf32>
    %24 = math.tanh %23 : vector<2x128xf32>
    %25 = vector.extract_strided_slice %10 {offsets = [0, 384], sizes = [2, 128], strides = [1, 1]} : vector<2x512xf32> to vector<2x128xf32>
    %26 = arith.negf %25 : vector<2x128xf32>
    %27 = math.exp %26 : vector<2x128xf32>
    %cst_11 = arith.constant 1.000000e+00 : f32
    %28 = vector.broadcast %cst_11 : f32 to vector<2x128xf32>
    %29 = arith.addf %28, %27 : vector<2x128xf32>
    %30 = arith.divf %28, %29 : vector<2x128xf32>
    %31 = arith.mulf %22, %4 : vector<2x128xf32>
    %32 = arith.mulf %16, %24 : vector<2x128xf32>
    %33 = arith.addf %31, %32 : vector<2x128xf32>
    %34 = math.tanh %33 : vector<2x128xf32>
    %35 = arith.mulf %30, %34 : vector<2x128xf32>
    %c0_12 = arith.constant 0 : index
    %c0_13 = arith.constant 0 : index
    %36 = vector.load %arg8[%c0_12, %c0_13] : memref<2x128xf32, #tpu.memory_space<vmem>>, vector<2x128xf32>
    tpu.vector_store %arg8[%c0_12, %c0_13], %33 {strides = array<i32>} : memref<2x128xf32, #tpu.memory_space<vmem>>, vector<2x128xf32>,
    %c0_14 = arith.constant 0 : index
    %c0_15 = arith.constant 0 : index
    %37 = vector.load %arg7[%c0_14, %c0_15] : memref<2x128xf32, #tpu.memory_space<vmem>>, vector<2x128xf32>
    tpu.vector_store %arg7[%c0_14, %c0_15], %35 {strides = array<i32>} : memref<2x128xf32, #tpu.memory_space<vmem>>, vector<2x128xf32>,
    %c1_i32 = arith.constant 1 : i32
    %c0_16 = arith.constant 0 : index
    %c0_17 = arith.constant 0 : index
    %38 = vector.load %arg7[%c0_16, %c0_17] : memref<2x128xf32, #tpu.memory_space<vmem>>, vector<2x128xf32>
    %c0_18 = arith.constant 0 : index
    %c0_19 = arith.constant 0 : index
    %39 = vector.load %arg8[%c0_18, %c0_19] : memref<2x128xf32, #tpu.memory_space<vmem>>, vector<2x128xf32>
    %c0_20 = arith.constant 0 : index
    %c0_21 = arith.constant 0 : index
    %40 = vector.load %arg6[%c0_20, %c0_21] : memref<128x512xf32, #tpu.memory_space<vmem>>, vector<128x512xf32>
    %cst_22 = arith.constant dense<0.000000e+00> : vector<2x512xf32>
    %41 = tpu.matmul %38, %40, %cst_22 {dimension_numbers = #tpu.dot_dimension_numbers<[1], [0], [0], [1], [0, 0, 1, 1], [], []>} : vector<2x128xf32>, vector<128x512xf32>, vector<2x512xf32> -> vector<2x512xf32>
    %42 = arith.index_cast %c1_i32 : i32 to index
    %c0_23 = arith.constant 0 : index
    %c0_24 = arith.constant 0 : index
    %43 = vector.load %arg1[%42, %c0_23, %c0_24] : memref<4x2x512xf32, #tpu.memory_space<vmem>>, vector<1x2x512xf32>
    %44 = vector.shape_cast %43 : vector<1x2x512xf32> to vector<2x512xf32>
    %45 = arith.addf %41, %44 : vector<2x512xf32>
    %46 = vector.extract_strided_slice %45 {offsets = [0, 0], sizes = [2, 128], strides = [1, 1]} : vector<2x512xf32> to vector<2x128xf32>
    %47 = arith.negf %46 : vector<2x128xf32>
    %48 = math.exp %47 : vector<2x128xf32>
    %cst_25 = arith.constant 1.000000e+00 : f32
    %49 = vector.broadcast %cst_25 : f32 to vector<2x128xf32>
    %50 = arith.addf %49, %48 : vector<2x128xf32>
    %51 = arith.divf %49, %50 : vector<2x128xf32>
    %52 = vector.extract_strided_slice %45 {offsets = [0, 128], sizes = [2, 128], strides = [1, 1]} : vector<2x512xf32> to vector<2x128xf32>
    %53 = arith.negf %52 : vector<2x128xf32>
    %54 = math.exp %53 : vector<2x128xf32>
    %cst_26 = arith.constant 1.000000e+00 : f32
    %55 = vector.broadcast %cst_26 : f32 to vector<2x128xf32>
    %56 = arith.addf %55, %54 : vector<2x128xf32>
    %57 = arith.divf %55, %56 : vector<2x128xf32>
    %58 = vector.extract_strided_slice %45 {offsets = [0, 256], sizes = [2, 128], strides = [1, 1]} : vector<2x512xf32> to vector<2x128xf32>
    %59 = math.tanh %58 : vector<2x128xf32>
    %60 = vector.extract_strided_slice %45 {offsets = [0, 384], sizes = [2, 128], strides = [1, 1]} : vector<2x512xf32> to vector<2x128xf32>
    %61 = arith.negf %60 : vector<2x128xf32>
    %62 = math.exp %61 : vector<2x128xf32>
    %cst_27 = arith.constant 1.000000e+00 : f32
    %63 = vector.broadcast %cst_27 : f32 to vector<2x128xf32>
    %64 = arith.addf %63, %62 : vector<2x128xf32>
    %65 = arith.divf %63, %64 : vector<2x128xf32>
    %66 = arith.mulf %57, %39 : vector<2x128xf32>
    %67 = arith.mulf %51, %59 : vector<2x128xf32>
    %68 = arith.addf %66, %67 : vector<2x128xf32>
    %69 = math.tanh %68 : vector<2x128xf32>
    %70 = arith.mulf %65, %69 : vector<2x128xf32>
    %c0_28 = arith.constant 0 : index
    %c0_29 = arith.constant 0 : index
    %71 = vector.load %arg8[%c0_28, %c0_29] : memref<2x128xf32, #tpu.memory_space<vmem>>, vector<2x128xf32>
    tpu.vector_store %arg8[%c0_28, %c0_29], %68 {strides = array<i32>} : memref<2x128xf32, #tpu.memory_space<vmem>>, vector<2x128xf32>,
    %c0_30 = arith.constant 0 : index
    %c0_31 = arith.constant 0 : index
    %72 = vector.load %arg7[%c0_30, %c0_31] : memref<2x128xf32, #tpu.memory_space<vmem>>, vector<2x128xf32>
    tpu.vector_store %arg7[%c0_30, %c0_31], %70 {strides = array<i32>} : memref<2x128xf32, #tpu.memory_space<vmem>>, vector<2x128xf32>,
    %c2_i32 = arith.constant 2 : i32
    %c0_32 = arith.constant 0 : index
    %c0_33 = arith.constant 0 : index
    %73 = vector.load %arg7[%c0_32, %c0_33] : memref<2x128xf32, #tpu.memory_space<vmem>>, vector<2x128xf32>
    %c0_34 = arith.constant 0 : index
    %c0_35 = arith.constant 0 : index
    %74 = vector.load %arg8[%c0_34, %c0_35] : memref<2x128xf32, #tpu.memory_space<vmem>>, vector<2x128xf32>
    %c0_36 = arith.constant 0 : index
    %c0_37 = arith.constant 0 : index
    %75 = vector.load %arg6[%c0_36, %c0_37] : memref<128x512xf32, #tpu.memory_space<vmem>>, vector<128x512xf32>
    %cst_38 = arith.constant dense<0.000000e+00> : vector<2x512xf32>
    %76 = tpu.matmul %73, %75, %cst_38 {dimension_numbers = #tpu.dot_dimension_numbers<[1], [0], [0], [1], [0, 0, 1, 1], [], []>} : vector<2x128xf32>, vector<128x512xf32>, vector<2x512xf32> -> vector<2x512xf32>
    %77 = arith.index_cast %c2_i32 : i32 to index
    %c0_39 = arith.constant 0 : index
    %c0_40 = arith.constant 0 : index
    %78 = vector.load %arg1[%77, %c0_39, %c0_40] : memref<4x2x512xf32, #tpu.memory_space<vmem>>, vector<1x2x512xf32>
    %79 = vector.shape_cast %78 : vector<1x2x512xf32> to vector<2x512xf32>
    %80 = arith.addf %76, %79 : vector<2x512xf32>
    %81 = vector.extract_strided_slice %80 {offsets = [0, 0], sizes = [2, 128], strides = [1, 1]} : vector<2x512xf32> to vector<2x128xf32>
    %82 = arith.negf %81 : vector<2x128xf32>
    %83 = math.exp %82 : vector<2x128xf32>
    %cst_41 = arith.constant 1.000000e+00 : f32
    %84 = vector.broadcast %cst_41 : f32 to vector<2x128xf32>
    %85 = arith.addf %84, %83 : vector<2x128xf32>
    %86 = arith.divf %84, %85 : vector<2x128xf32>
    %87 = vector.extract_strided_slice %80 {offsets = [0, 128], sizes = [2, 128], strides = [1, 1]} : vector<2x512xf32> to vector<2x128xf32>
    %88 = arith.negf %87 : vector<2x128xf32>
    %89 = math.exp %88 : vector<2x128xf32>
    %cst_42 = arith.constant 1.000000e+00 : f32
    %90 = vector.broadcast %cst_42 : f32 to vector<2x128xf32>
    %91 = arith.addf %90, %89 : vector<2x128xf32>
    %92 = arith.divf %90, %91 : vector<2x128xf32>
    %93 = vector.extract_strided_slice %80 {offsets = [0, 256], sizes = [2, 128], strides = [1, 1]} : vector<2x512xf32> to vector<2x128xf32>
    %94 = math.tanh %93 : vector<2x128xf32>
    %95 = vector.extract_strided_slice %80 {offsets = [0, 384], sizes = [2, 128], strides = [1, 1]} : vector<2x512xf32> to vector<2x128xf32>
    %96 = arith.negf %95 : vector<2x128xf32>
    %97 = math.exp %96 : vector<2x128xf32>
    %cst_43 = arith.constant 1.000000e+00 : f32
    %98 = vector.broadcast %cst_43 : f32 to vector<2x128xf32>
    %99 = arith.addf %98, %97 : vector<2x128xf32>
    %100 = arith.divf %98, %99 : vector<2x128xf32>
    %101 = arith.mulf %92, %74 : vector<2x128xf32>
    %102 = arith.mulf %86, %94 : vector<2x128xf32>
    %103 = arith.addf %101, %102 : vector<2x128xf32>
    %104 = math.tanh %103 : vector<2x128xf32>
    %105 = arith.mulf %100, %104 : vector<2x128xf32>
    %c0_44 = arith.constant 0 : index
    %c0_45 = arith.constant 0 : index
    %106 = vector.load %arg8[%c0_44, %c0_45] : memref<2x128xf32, #tpu.memory_space<vmem>>, vector<2x128xf32>
    tpu.vector_store %arg8[%c0_44, %c0_45], %103 {strides = array<i32>} : memref<2x128xf32, #tpu.memory_space<vmem>>, vector<2x128xf32>,
    %c0_46 = arith.constant 0 : index
    %c0_47 = arith.constant 0 : index
    %107 = vector.load %arg7[%c0_46, %c0_47] : memref<2x128xf32, #tpu.memory_space<vmem>>, vector<2x128xf32>
    tpu.vector_store %arg7[%c0_46, %c0_47], %105 {strides = array<i32>} : memref<2x128xf32, #tpu.memory_space<vmem>>, vector<2x128xf32>,
    %c3_i32 = arith.constant 3 : i32
    %c0_48 = arith.constant 0 : index
    %c0_49 = arith.constant 0 : index
    %108 = vector.load %arg7[%c0_48, %c0_49] : memref<2x128xf32, #tpu.memory_space<vmem>>, vector<2x128xf32>
    %c0_50 = arith.constant 0 : index
    %c0_51 = arith.constant 0 : index
    %109 = vector.load %arg8[%c0_50, %c0_51] : memref<2x128xf32, #tpu.memory_space<vmem>>, vector<2x128xf32>
    %c0_52 = arith.constant 0 : index
    %c0_53 = arith.constant 0 : index
    %110 = vector.load %arg6[%c0_52, %c0_53] : memref<128x512xf32, #tpu.memory_space<vmem>>, vector<128x512xf32>
    %cst_54 = arith.constant dense<0.000000e+00> : vector<2x512xf32>
    %111 = tpu.matmul %108, %110, %cst_54 {dimension_numbers = #tpu.dot_dimension_numbers<[1], [0], [0], [1], [0, 0, 1, 1], [], []>} : vector<2x128xf32>, vector<128x512xf32>, vector<2x512xf32> -> vector<2x512xf32>
    %112 = arith.index_cast %c3_i32 : i32 to index
    %c0_55 = arith.constant 0 : index
    %c0_56 = arith.constant 0 : index
    %113 = vector.load %arg1[%112, %c0_55, %c0_56] : memref<4x2x512xf32, #tpu.memory_space<vmem>>, vector<1x2x512xf32>
    %114 = vector.shape_cast %113 : vector<1x2x512xf32> to vector<2x512xf32>
    %115 = arith.addf %111, %114 : vector<2x512xf32>
    %116 = vector.extract_strided_slice %115 {offsets = [0, 0], sizes = [2, 128], strides = [1, 1]} : vector<2x512xf32> to vector<2x128xf32>
    %117 = arith.negf %116 : vector<2x128xf32>
    %118 = math.exp %117 : vector<2x128xf32>
    %cst_57 = arith.constant 1.000000e+00 : f32
    %119 = vector.broadcast %cst_57 : f32 to vector<2x128xf32>
    %120 = arith.addf %119, %118 : vector<2x128xf32>
    %121 = arith.divf %119, %120 : vector<2x128xf32>
    %122 = vector.extract_strided_slice %115 {offsets = [0, 128], sizes = [2, 128], strides = [1, 1]} : vector<2x512xf32> to vector<2x128xf32>
    %123 = arith.negf %122 : vector<2x128xf32>
    %124 = math.exp %123 : vector<2x128xf32>
    %cst_58 = arith.constant 1.000000e+00 : f32
    %125 = vector.broadcast %cst_58 : f32 to vector<2x128xf32>
    %126 = arith.addf %125, %124 : vector<2x128xf32>
    %127 = arith.divf %125, %126 : vector<2x128xf32>
    %128 = vector.extract_strided_slice %115 {offsets = [0, 256], sizes = [2, 128], strides = [1, 1]} : vector<2x512xf32> to vector<2x128xf32>
    %129 = math.tanh %128 : vector<2x128xf32>
    %130 = vector.extract_strided_slice %115 {offsets = [0, 384], sizes = [2, 128], strides = [1, 1]} : vector<2x512xf32> to vector<2x128xf32>
    %131 = arith.negf %130 : vector<2x128xf32>
    %132 = math.exp %131 : vector<2x128xf32>
    %cst_59 = arith.constant 1.000000e+00 : f32
    %133 = vector.broadcast %cst_59 : f32 to vector<2x128xf32>
    %134 = arith.addf %133, %132 : vector<2x128xf32>
    %135 = arith.divf %133, %134 : vector<2x128xf32>
    %136 = arith.mulf %127, %109 : vector<2x128xf32>
    %137 = arith.mulf %121, %129 : vector<2x128xf32>
    %138 = arith.addf %136, %137 : vector<2x128xf32>
    %139 = math.tanh %138 : vector<2x128xf32>
    %140 = arith.mulf %135, %139 : vector<2x128xf32>
    %c0_60 = arith.constant 0 : index
    %c0_61 = arith.constant 0 : index
    %141 = vector.load %arg8[%c0_60, %c0_61] : memref<2x128xf32, #tpu.memory_space<vmem>>, vector<2x128xf32>
    tpu.vector_store %arg8[%c0_60, %c0_61], %138 {strides = array<i32>} : memref<2x128xf32, #tpu.memory_space<vmem>>, vector<2x128xf32>,
    %c0_62 = arith.constant 0 : index
    %c0_63 = arith.constant 0 : index
    %142 = vector.load %arg7[%c0_62, %c0_63] : memref<2x128xf32, #tpu.memory_space<vmem>>, vector<2x128xf32>
    tpu.vector_store %arg7[%c0_62, %c0_63], %140 {strides = array<i32>} : memref<2x128xf32, #tpu.memory_space<vmem>>, vector<2x128xf32>,
    %c4_i32 = arith.constant 4 : i32
    %c1_i32_64 = arith.constant 1 : i32
    %143 = arith.cmpi eq, %arg0, %c1_i32_64 : i32
    %144 = arith.extui %143 : i1 to i32
    %c0_i32_65 = arith.constant 0 : i32
    %145 = arith.cmpi ne, %144, %c0_i32_65 : i32
    scf.if %145 {
      %c0_66 = arith.constant 0 : index
      %c0_67 = arith.constant 0 : index
      %146 = vector.load %arg7[%c0_66, %c0_67] : memref<2x128xf32, #tpu.memory_space<vmem>>, vector<2x128xf32>
      %c0_68 = arith.constant 0 : index
      %c0_69 = arith.constant 0 : index
      %147 = vector.load %arg3[%c0_68, %c0_69] : memref<128x1xf32, #tpu.memory_space<vmem>>, vector<128x1xf32>
      %cst_70 = arith.constant dense<0.000000e+00> : vector<2x1xf32>
      %148 = tpu.matmul %146, %147, %cst_70 {dimension_numbers = #tpu.dot_dimension_numbers<[1], [0], [0], [1], [0, 0, 1, 1], [], []>} : vector<2x128xf32>, vector<128x1xf32>, vector<2x1xf32> -> vector<2x1xf32>
      %c0_71 = arith.constant 0 : index
      %c0_72 = arith.constant 0 : index
      %149 = vector.load %arg4[%c0_71, %c0_72] : memref<1x1xf32, #tpu.memory_space<vmem>>, vector<1x1xf32>
      %150 = vector.broadcast %149 : vector<1x1xf32> to vector<2x1xf32>
      %151 = arith.addf %148, %150 : vector<2x1xf32>
      %c0_73 = arith.constant 0 : index
      %c0_74 = arith.constant 0 : index
      %152 = vector.load %arg5[%c0_73, %c0_74] : memref<2x1xf32, #tpu.memory_space<vmem>>, vector<2x1xf32>
      tpu.vector_store %arg5[%c0_73, %c0_74], %151 {strides = array<i32>} : memref<2x1xf32, #tpu.memory_space<vmem>>, vector<2x1xf32>,
    } else {
    }
    return
  }
  func.func @transform_0(%arg0: i32) -> (i32, i32, i32) {
    %c0_i32 = arith.constant 0 : i32
    %c0_i32_0 = arith.constant 0 : i32
    %c0_i32_1 = arith.constant 0 : i32
    return %arg0, %c0_i32, %c0_i32_0 : i32, i32, i32
  }
  func.func @transform_2(%arg0: i32) -> (i32, i32) {
    %c0_i32 = arith.constant 0 : i32
    %c0_i32_0 = arith.constant 0 : i32
    %c0_i32_1 = arith.constant 0 : i32
    return %c0_i32, %c0_i32_0 : i32, i32
  }
  func.func @transform_3(%arg0: i32) -> (i32, i32) {
    %c0_i32 = arith.constant 0 : i32
    %c0_i32_0 = arith.constant 0 : i32
    %c0_i32_1 = arith.constant 0 : i32
    return %c0_i32, %c0_i32_0 : i32, i32
  }
  func.func @transform_4(%arg0: i32) -> (i32, i32) {
    %c0_i32 = arith.constant 0 : i32
    %c0_i32_0 = arith.constant 0 : i32
    %c0_i32_1 = arith.constant 0 : i32
    return %c0_i32, %c0_i32_0 : i32, i32
  }
}

</mosaic_0001>

<bundles_post_ra>
// kernel: tpu_custom_call.1
= control target key start
LH: loop header
LB: loop body
LE: loop exit
PB: predicated region body
PF: predicated region fallthrough
CT: control target
= control target key end

     0   :  { %s1577_s17 = smov 0   ;;  %s2027_s0 = inlined_call_operand.vmem [shape: f32[8,2,512], index: 0, kind: input, shape index: {}]   ;;  %s2028_s1 = inlined_call_operand.hbm [shape: f32[128,512], index: 1, kind: input, shape index: {}]   ;;  %s2029_s2 = inlined_call_operand.vmem [shape: f32[128,1], index: 2, kind: input, shape index: {}]   ;;  %s2030_s3 = inlined_call_operand.<no memory space> [shape: f32[1,1], index: 3, kind: input, shape index: {}]   ;;  %s2031_s4 = inlined_call_operand.vmem [shape: f32[2,1], index: 4, kind: output, shape index: {}]  }
   0x1   :  { %v9_v0 = vstv %s2030_s3 }
   0x2   :  { %10 = vst [vmem:[#allocation6] sm:$0x1] %v9_v0 }
   0x3 LB: > { %s1583_s18 = sadd.s32 4294967295, %s1541_s17   ;;  %p1353_p0 = scmp.ge.s32.totalorder %s1541_s17, 1  ;;  %s1541_s17 = sphi %s1577_s17, %s16_s17  }
   0x4   : > { %p137_p1 = scmp.lt.s32.totalorder %s1541_s17, 3 }
   0x6   : > { %p138_p2 = pnand %p1353_p0, %p137_p1 }
   0x8   : > { %141 = sbr.rel (%p138_p2) target bundleno = 1312 (0x520), region = 32 }
   0xd   : > { %s1354_s19 = sshll.u32 %s1583_s18, 2  ;;  %p1357_p4 = scmp.ne.s32.totalorder %s1583_s18, 0 }
   0xe   : > { %p158_p3 = scmp.lt.s32.totalorder %s1354_s19, 7  ;;  %s1543_s23 = smov (!%p1357_p4), [#allocation2]  }
   0xf   : > { %167 = sbr.rel (%p1357_p4) target bundleno = 29 (0x1d), region = 36  ;;  %s175_s24 = sshll.u32 (!%p1357_p4), %s1543_s23, 4  ;;  %s176_s24 = int_to_ptr.vmem [resolvable:$true] %s175_s24 }
  0x10   : > { %s2113_s19 = smov (!%p158_p3, %s1354_s19), 7  ;;  %s1521_s25 = scalar_lea.vmem (!%p1357_p4), %s176_s24, 8192 }
  0x11   : > { %s1378_s3 = sshll.u32 %s2113_s19, 3  ;;  %p1522_p5 = scmp.ne.s32.totalorder (!%p1357_p4), %s176_s24, %s1521_s25 }
  0x12   : > { %s1591_s22 = scalar_lea.vmem %s2027_s0, %s1378_s3  ;;  %p1526_p6 = scmp.lt.s32.totalorder (!%p1357_p4), %s176_s24, %s176_s24 }
  0x13   : > { %p1527_p7 = scmp.lt.s32.totalorder (!%p1357_p4), %s1521_s25, %s1521_s25 }
  0x14   : > { %v1544_v1 = vmov 0.0  }
  0x15   : > { %179 = vst [vmem:[#allocation3] sm:$0x3] %v1544_v1  ;;  %180 = vst [vmem:[#allocation4] sm:$0x3] %v1544_v1  ;;  %p1528_p8 = por %p1527_p7, %p1526_p6 }
  0x17   : > { %p1529_p9 = pnand %p1528_p8, %p1522_p5 }
  0x19   : > { %1532 = shalt.err (!%p1529_p9)  }
  0x1a   : > { %178 = dma.hbm_to_vmem [thread:$0]  %s2028_s1, 8192, %s176_s24, [#allocation5] }
  0x1b   : > { %1537 = dma.done.wait [#allocation5], 8192 }
  0x1c   : > { %1538 = vsyncadd [#allocation5], 4294959104 }
  0x1d PF: > { %v1597_v2 = vld [vmem:[#allocation2 + $0x1e8] sm:$0xff]  ;;  %v1599_v3 = vld [vmem:[#allocation2 + $0x1e0] sm:$0xff]  ;;  %v2032_v6 = vmov 0.0   ;;  %v1620_v11 = vld [vmem:[#allocation2 + $0x1f8] sm:$0xff]  ;;  %p1373_p10 = scmp.ne.s32.totalorder %s1583_s18, 1 }
  0x1e   : > { %2067 = vst [vmem:[#allocation12_spill] sm:$0xff] %v1597_v2  ;;  %v1601_v4 = vld [vmem:[#allocation2 + $0x1c8] sm:$0xff]  ;;  %274 = vmatprep.subr.mxu0 %v1597_v2  ;;  %v1604_v5 = vld [vmem:[#allocation2 + $0x1c0] sm:$0xff]  ;;  %338 = vmatprep.mubr.f32.mxu0 %v2032_v6  ;;  %2068 = vst [vmem:[#allocation13_spill] sm:$0xff] %v1620_v11 }
  0x1f   : > { %275 = vmatpush1.msra.mxu0 %v1599_v3  ;;  %v1608_v7 = vld [vmem:[#allocation2 + $0x1a8] sm:$0xff]  ;;  %409 = vmatprep.mubr.f32.mxu1 %v2032_v6  ;;  %v1612_v8 = vld [vmem:[#allocation2 + $0x1a0] sm:$0xff]  ;;  %v1626_v13 = vld [vmem:[#allocation2 + $0x1f0] sm:$0xff] }
  0x20   : > { %276 = vmatprep.subr.mxu0 %v1601_v4  ;;  %v1615_v9 = vld [vmem:[#allocation2 + $0x188] sm:$0xff]  ;;  %v1618_v10 = vld [vmem:[#allocation2 + $0x180] sm:$0xff]  ;;  %345 = vmatprep.subr.mxu1 %v1620_v11  ;;  %v1632_v15 = vld [vmem:[#allocation2 + $0x1d8] sm:$0xff] }
  0x21   : > { %277 = vmatpush1.msra.mxu0 %v1604_v5  ;;  %v1623_v12 = vld [vmem:[#allocation2 + $0x168] sm:$0xff]  ;;  %v1629_v14 = vld [vmem:[#allocation2 + $0x160] sm:$0xff]  ;;  %346 = vmatpush1.msra.mxu1 %v1626_v13  ;;  %v1634_v16 = vld [vmem:[#allocation2 + $0x1d0] sm:$0xff] }
  0x22   : > { %278 = vmatprep.subr.mxu0 %v1608_v7  ;;  %v1637_v17 = vld [vmem:[#allocation2 + $0x148] sm:$0xff]  ;;  %347 = vmatprep.subr.mxu1 %v1632_v15  ;;  %v1640_v18 = vld [vmem:[#allocation2 + $0x1b8] sm:$0xff]  ;;  %v1643_v19 = vld [vmem:[#allocation2 + $0x140] sm:$0xff] }
  0x23   : > { %279 = vmatpush1.msra.mxu0 %v1612_v8  ;;  %348 = vmatpush1.msra.mxu1 %v1634_v16  ;;  %v1646_v20 = vld [vmem:[#allocation2 + $0x1b0] sm:$0xff]  ;;  %v1648_v21 = vld [vmem:[#allocation2 + $0x198] sm:$0xff]  ;;  %v1651_v22 = vld [vmem:[#allocation2 + $0x128] sm:$0xff] }
  0x24   : > { %280 = vmatprep.subr.mxu0 %v1615_v9  ;;  %349 = vmatprep.subr.mxu1 %v1640_v18  ;;  %v1654_v23 = vld [vmem:[#allocation2 + $0x190] sm:$0xff]  ;;  %v1657_v24 = vld [vmem:[#allocation2 + $0x120] sm:$0xff]  ;;  %v1660_v25 = vld [vmem:[#allocation2 + $0x178] sm:$0xff] }
  0x25   : > { %281 = vmatpush1.msra.mxu0 %v1618_v10  ;;  %350 = vmatpush1.msra.mxu1 %v1646_v20  ;;  %v1663_v26 = vld [vmem:[#allocation2 + $0x108] sm:$0xff]  ;;  %v1666_v27 = vld [vmem:[#allocation2 + $0x170] sm:$0xff]  ;;  %v1669_v28 = vld [vmem:[#allocation2 + $0x100] sm:$0xff] }
  0x26   : > { %282 = vmatprep.subr.mxu0 %v1623_v12  ;;  %351 = vmatprep.subr.mxu1 %v1648_v21  ;;  %v1672_v29 = vld [vmem:[#allocation2 + $0x158] sm:$0xff]  ;;  %v1675_v30 = vld [vmem:[#allocation2 + $0xe8] sm:$0xff]  ;;  %v1678_v31 = vld [vmem:[#allocation2 + $0x150] sm:$0xff] }
  0x27   : > { %283 = vmatpush1.msra.mxu0 %v1629_v14  ;;  %352 = vmatpush1.msra.mxu1 %v1654_v23  ;;  %v1681_v32 = vld [vmem:[#allocation2 + $0xe0] sm:$0xff]  ;;  %v1684_v33 = vld [vmem:[#allocation2 + $0x138] sm:$0xff]  ;;  %v1687_v34 = vld [vmem:[#allocation2 + $0xc8] sm:$0xff] }
  0x28   : > { %284 = vmatprep.subr.mxu0 %v1637_v17  ;;  %353 = vmatprep.subr.mxu1 %v1660_v25  ;;  %v1690_v35 = vld [vmem:[#allocation2 + $0x130] sm:$0xff]  ;;  %v1693_v36 = vld [vmem:[#allocation2 + $0xc0] sm:$0xff]  ;;  %v1696_v37 = vld [vmem:[#allocation2 + $0x118] sm:$0xff] }
  0x29   : > { %285 = vmatpush1.msra.mxu0 %v1643_v19  ;;  %354 = vmatpush1.msra.mxu1 %v1666_v27  ;;  %v1699_v38 = vld [vmem:[#allocation2 + $0xa8] sm:$0xff]  ;;  %v1702_v39 = vld [vmem:[#allocation2 + $0x110] sm:$0xff]  ;;  %v1705_v40 = vld [vmem:[#allocation2 + $0xa0] sm:$0xff] }
  0x2a   : > { %286 = vmatprep.subr.mxu0 %v1651_v22  ;;  %355 = vmatprep.subr.mxu1 %v1672_v29  ;;  %v1708_v41 = vld [vmem:[#allocation2 + $0xf8] sm:$0xff]  ;;  %v1711_v42 = vld [vmem:[#allocation2 + $0x88] sm:$0xff]  ;;  %v1714_v43 = vld [vmem:[#allocation2 + $0xf0] sm:$0xff] }
  0x2b   : > { %287 = vmatpush1.msra.mxu0 %v1657_v24  ;;  %356 = vmatpush1.msra.mxu1 %v1678_v31  ;;  %v1717_v44 = vld [vmem:[#allocation2 + $0x80] sm:$0xff]  ;;  %v1720_v45 = vld [vmem:[#allocation2 + $0xd8] sm:$0xff]  ;;  %v1723_v46 = vld [vmem:[#allocation2 + $0x68] sm:$0xff] }
  0x2c   : > { %288 = vmatprep.subr.mxu0 %v1663_v26  ;;  %357 = vmatprep.subr.mxu1 %v1684_v33  ;;  %2069 = vst [vmem:[#allocation14_spill] sm:$0xff] %v1717_v44  ;;  %2070 = vst [vmem:[#allocation15_spill] sm:$0xff] %v1723_v46  ;;  %v1726_v47 = vld [vmem:[#allocation2 + $0xd0] sm:$0xff]  ;;  %v1729_v48 = vld [vmem:[#allocation2 + $0x60] sm:$0xff] }
  0x2d   : > { %289 = vmatpush1.msra.mxu0 %v1669_v28  ;;  %358 = vmatpush1.msra.mxu1 %v1690_v35  ;;  %2071 = vst [vmem:[#allocation16_spill] sm:$0xff] %v1729_v48  ;;  %v1732_v49 = vld [vmem:[#allocation2 + $0xb8] sm:$0xff]  ;;  %v1735_v50 = vld [vmem:[#allocation2 + $0x48] sm:$0xff]  ;;  %v1738_v51 = vld [vmem:[#allocation2 + $0xb0] sm:$0xff] }
  0x2e   : > { %290 = vmatprep.subr.mxu0 %v1675_v30  ;;  %359 = vmatprep.subr.mxu1 %v1696_v37  ;;  %2072 = vst [vmem:[#allocation17_spill] sm:$0xff] %v1735_v50  ;;  %v1741_v52 = vld [vmem:[#allocation2 + $0x40] sm:$0xff]  ;;  %v1744_v53 = vld [vmem:[#allocation2 + $0x98] sm:$0xff]  ;;  %v1747_v54 = vld [vmem:[#allocation2 + $0x28] sm:$0xff] }
  0x2f   : > { %291 = vmatpush1.msra.mxu0 %v1681_v32  ;;  %360 = vmatpush1.msra.mxu1 %v1702_v39  ;;  %2073 = vst [vmem:[#allocation18_spill] sm:$0xff] %v1741_v52  ;;  %2074 = vst [vmem:[#allocation19_spill] sm:$0xff] %v1744_v53  ;;  %v1750_v55 = vld [vmem:[#allocation2 + $0x90] sm:$0xff]  ;;  %v1753_v56 = vld [vmem:[#allocation2 + $0x20] sm:$0xff] }
  0x30   : > { %292 = vmatprep.subr.mxu0 %v1687_v34  ;;  %361 = vmatprep.subr.mxu1 %v1708_v41  ;;  %2075 = vst [vmem:[#allocation20_spill] sm:$0xff] %v1747_v54  ;;  %2076 = vst [vmem:[#allocation21_spill] sm:$0xff] %v1750_v55  ;;  %v1756_v57 = vld [vmem:[#allocation2 + $0x78] sm:$0xff]  ;;  %v1759_v58 = vld [vmem:[#allocation2 + $0x8] sm:$0xff] }
  0x31   : > { %293 = vmatpush1.msra.mxu0 %v1693_v36  ;;  %362 = vmatpush1.msra.mxu1 %v1714_v43  ;;  %2077 = vst [vmem:[#allocation22_spill] sm:$0xff] %v1753_v56  ;;  %2078 = vst [vmem:[#allocation23_spill] sm:$0xff] %v1756_v57  ;;  %v1762_v59 = vld [vmem:[#allocation2 + $0x70] sm:$0xff]  ;;  %v1765_v60 = vld [vmem:[#allocation2] sm:$0xff] }
  0x32   : > { %294 = vmatprep.subr.mxu0 %v1699_v38  ;;  %363 = vmatprep.subr.mxu1 %v1720_v45  ;;  %2079 = vst [vmem:[#allocation24_spill] sm:$0xff] %v1759_v58  ;;  %2080 = vst [vmem:[#allocation25_spill] sm:$0xff] %v1762_v59  ;;  %v1768_v61 = vld [vmem:[#allocation2 + $0x58] sm:$0xff]  ;;  %v185_v62 = vld [vmem:[#allocation3] sm:$0x3] }
  0x33   : > { %295 = vmatpush1.msra.mxu0 %v1705_v40  ;;  %364 = vmatpush1.msra.mxu1 %v1726_v47  ;;  %2081 = vst [vmem:[#allocation26_spill] sm:$0xff] %v1765_v60  ;;  %2082 = vst [vmem:[#allocation27_spill] sm:$0xff] %v1768_v61  ;;  %v1772_v63 = vld [vmem:[#allocation2 + $0x50] sm:$0xff]  ;;  %v1776_v0 = vld [vmem:[#allocation2 + $0x38] sm:$0xff] }
  0x34   : > { %296 = vmatprep.subr.mxu0 %v1711_v42  ;;  %365 = vmatprep.subr.mxu1 %v1732_v49  ;;  %2083 = vst [vmem:[#allocation28_spill] sm:$0xff] %v1772_v63  ;;  %2084 = vst [vmem:[#allocation29_spill] sm:$0xff] %v1776_v0  ;;  %v1780_v1 = vld [vmem:[#allocation2 + $0x30] sm:$0xff]  ;;  %v1783_v6 = vld [vmem:[#allocation2 + $0x18] sm:$0xff] }
  0x35   : > { %297 = vmatpush1.msra.mxu0 %v1717_v44  ;;  %366 = vmatpush1.msra.mxu1 %v1738_v51  ;;  %2085 = vst [vmem:[#allocation30_spill] sm:$0xff] %v1780_v1  ;;  %2086 = vst [vmem:[#allocation31_spill] sm:$0xff] %v1783_v6 }
  0x36   : > { %298 = vmatprep.subr.mxu0 %v1723_v46  ;;  %367 = vmatprep.subr.mxu1 %v1744_v53 }
  0x37   : > { %299 = vmatpush1.msra.mxu0 %v1729_v48  ;;  %368 = vmatpush1.msra.mxu1 %v1750_v55 }
  0x38   : > { %300 = vmatprep.subr.mxu0 %v1735_v50  ;;  %369 = vmatprep.subr.mxu1 %v1756_v57 }
  0x39   : > { %301 = vmatpush1.msra.mxu0 %v1741_v52  ;;  %370 = vmatpush1.msra.mxu1 %v1762_v59 }
  0x3a   : > { %302 = vmatprep.subr.mxu0 %v1747_v54  ;;  %371 = vmatprep.subr.mxu1 %v1768_v61 }
  0x3b   : > { %303 = vmatpush1.msra.mxu0 %v1753_v56  ;;  %372 = vmatpush1.msra.mxu1 %v1772_v63  ;;  %v1786_v56 = vld [vmem:[#allocation2 + $0x10] sm:$0xff] }
  0x3c   : > { %304 = vmatprep.subr.mxu0 %v1759_v58  ;;  %373 = vmatprep.subr.mxu1 %v1776_v0  ;;  %2087 = vst [vmem:[#allocation32_spill] sm:$0xff] %v1786_v56 }
  0x3d   : > { %305 = vmatpush1.msra.mxu0 %v1765_v60  ;;  %374 = vmatpush1.msra.mxu1 %v1780_v1 }
  0x3e   : > { %339 = vmatmul.mubr.f32.vlgmr.msra.gmra.mxu0 %v185_v62  ;;  %532 = vmatprep.subr.mxu0 %v1597_v2 }
  0x3f   : > { %533 = vmatpush1.msra.mxu0 %v1599_v3  ;;  %375 = vmatprep.subr.mxu1 %v1783_v6 }
  0x40   : > { %534 = vmatprep.subr.mxu0 %v1601_v4  ;;  %376 = vmatpush1.msra.mxu1 %v1786_v56 }
  0x41   : > { %535 = vmatpush1.msra.mxu0 %v1604_v5  ;;  %410 = vmatmul.mubr.f32.vlgmr.msra.gmra.mxu1 %v185_v62  ;;  %v2088_v62 = vld [vmem:[#allocation22_spill] sm:$0xff] }
  0x42   : > { %603 = vmatprep.subr.mxu1 %v1620_v11  ;;  %536 = vmatprep.subr.mxu0 %v1608_v7 }
  0x43   : > { %604 = vmatpush1.msra.mxu1 %v1626_v13  ;;  %537 = vmatpush1.msra.mxu0 %v1612_v8 }
  0x44   : > { %605 = vmatprep.subr.mxu1 %v1632_v15  ;;  %538 = vmatprep.subr.mxu0 %v1615_v9 }
  0x45   : > { %606 = vmatpush1.msra.mxu1 %v1634_v16  ;;  %539 = vmatpush1.msra.mxu0 %v1618_v10 }
  0x46   : > { %607 = vmatprep.subr.mxu1 %v1640_v18  ;;  %540 = vmatprep.subr.mxu0 %v1623_v12 }
  0x47   : > { %608 = vmatpush1.msra.mxu1 %v1646_v20  ;;  %541 = vmatpush1.msra.mxu0 %v1629_v14 }
  0x48   : > { %609 = vmatprep.subr.mxu1 %v1648_v21  ;;  %542 = vmatprep.subr.mxu0 %v1637_v17 }
  0x49   : > { %610 = vmatpush1.msra.mxu1 %v1654_v23  ;;  %543 = vmatpush1.msra.mxu0 %v1643_v19 }
  0x4a   : > { %611 = vmatprep.subr.mxu1 %v1660_v25  ;;  %544 = vmatprep.subr.mxu0 %v1651_v22 }
  0x4b   : > { %612 = vmatpush1.msra.mxu1 %v1666_v27  ;;  %545 = vmatpush1.msra.mxu0 %v1657_v24 }
  0x4c   : > { %613 = vmatprep.subr.mxu1 %v1672_v29  ;;  %546 = vmatprep.subr.mxu0 %v1663_v26 }
  0x4d   : > { %614 = vmatpush1.msra.mxu1 %v1678_v31  ;;  %547 = vmatpush1.msra.mxu0 %v1669_v28 }
  0x4e   : > { %615 = vmatprep.subr.mxu1 %v1684_v33  ;;  %548 = vmatprep.subr.mxu0 %v1675_v30 }
  0x4f   : > { %616 = vmatpush1.msra.mxu1 %v1690_v35  ;;  %549 = vmatpush1.msra.mxu0 %v1681_v32 }
  0x50   : > { %617 = vmatprep.subr.mxu1 %v1696_v37  ;;  %550 = vmatprep.subr.mxu0 %v1687_v34 }
  0x51   : > { %618 = vmatpush1.msra.mxu1 %v1702_v39  ;;  %551 = vmatpush1.msra.mxu0 %v1693_v36 }
  0x52   : > { %619 = vmatprep.subr.mxu1 %v1708_v41  ;;  %552 = vmatprep.subr.mxu0 %v1699_v38 }
  0x53   : > { %620 = vmatpush1.msra.mxu1 %v1714_v43  ;;  %553 = vmatpush1.msra.mxu0 %v1705_v40 }
  0x54   : > { %621 = vmatprep.subr.mxu1 %v1720_v45  ;;  %554 = vmatprep.subr.mxu0 %v1711_v42 }
  0x55   : > { %622 = vmatpush1.msra.mxu1 %v1726_v47  ;;  %555 = vmatpush1.msra.mxu0 %v1717_v44 }
  0x56   : > { %623 = vmatprep.subr.mxu1 %v1732_v49  ;;  %556 = vmatprep.subr.mxu0 %v1723_v46 }
  0x57   : > { %624 = vmatpush1.msra.mxu1 %v1738_v51  ;;  %557 = vmatpush1.msra.mxu0 %v1729_v48 }
  0x58   : > { %625 = vmatprep.subr.mxu1 %v1744_v53  ;;  %558 = vmatprep.subr.mxu0 %v1735_v50 }
  0x59   : > { %626 = vmatpush1.msra.mxu1 %v1750_v55  ;;  %559 = vmatpush1.msra.mxu0 %v1741_v52  ;;  %v2089_v52 = vmov 0.0  }
  0x5a   : > { %627 = vmatprep.subr.mxu1 %v1756_v57  ;;  %560 = vmatprep.subr.mxu0 %v1747_v54  ;;  %v257_v54 = vlaneseq }
  0x5b   : > { %628 = vmatpush1.msra.mxu1 %v1762_v59  ;;  %561 = vmatpush1.msra.mxu0 %v2088_v62 }
  0x5c   : > { %629 = vmatprep.subr.mxu1 %v1768_v61  ;;  %562 = vmatprep.subr.mxu0 %v1759_v58  ;;  %v1546_v58 = vmov 1983009808  }
  0x5d   : > { %630 = vmatpush1.msra.mxu1 %v1772_v63  ;;  %563 = vmatpush1.msra.mxu0 %v1765_v60  ;;  %v255_v62 = vunpack.c.l.s4 %v1546_v58  ;;  %v258_v63 = vshrl.u32 %v257_v54, 7 }
  0x5e   : > { %631 = vmatprep.subr.mxu1 %v1776_v0  ;;  %596 = vmatprep.mubr.f32.mxu0 %v2089_v52 }
  0x5f   : > { %632 = vmatpush1.msra.mxu1 %v1780_v1  ;;  %667 = vmatprep.mubr.f32.mxu1 %v2089_v52  ;;  %v256_v0 = vunpack.c.0.s8 %v255_v62  ;;  %v251_v1 = vld [vmem:[%s1591_s22] sm:$0xff] }
  0x60   : > { %633 = vmatprep.subr.mxu1 %v1783_v6  ;;  %790 = vmatprep.subr.mxu0 %v1597_v2  ;;  %v253_v59 = vcombine.high %v251_v1, %v251_v1 }
  0x61   : > { %634 = vmatpush1.msra.mxu1 %v1786_v56  ;;  %v1859_v60 = vsub.s32 %v256_v0, %v258_v63 }
  0x62   : > { %861 = vmatprep.subr.mxu1 %v1620_v11 }
  0x63   : > { %v260_v61 = vrot.slane %v251_v1, %v1859_v60  ;;  %v267_v2 = vrot.slane %v253_v59, %v1859_v60 }
  0x65   : > { %v268_v50 = vcombine.high %v260_v61, %v260_v61  ;;  %v269_v62 = vcombine.high %v267_v2, %v267_v2 }
  0xfe   : > { %v340_v6 = vpop.f32.mrf.mxu0 }
  0xff   : > { %v341_v52 = vadd.f32 %v340_v6, %v260_v61 }
 0x100   : > { %v342_v48 = vpop.f32.mrf.mxu0 }
 0x101   : > { %v1358_v56 = vmul.f32 -1.442695, %v341_v52  ;;  %v343_v57 = vadd.f32 %v342_v48, %v268_v50  ;;  %v411_v58 = vpop.f32.mrf.mxu1 }
 0x102   : > { %v412_v0 = vadd.f32 %v411_v58, %v267_v2 }
 0x103   : > { %1449 = vpow2.f32 %v1358_v56  ;;  %v1359_v11 = vmul.f32 -1.442695, %v343_v57  ;;  %v413_v54 = vpop.f32.mrf.mxu1  ;;  %v186_v56 = vld [vmem:[#allocation4] sm:$0x3] }
 0x104   : > { %v414_v63 = vadd.f32 %v413_v54, %v269_v62 }
 0x105   : > { %1451 = vpow2.f32 %v1359_v11 }
 0x106   : > { %v1360_v46 = vmul.f32 -1.442695, %v414_v63  ;;  %1453 = vtanh.f32 %v412_v0 }
 0x108   : > { %1455 = vpow2.f32 %v1360_v46 }
 0x110   : > { %v1450_v55 = vpop.eup %1449 }
 0x111   : > { %v419_v44 = vadd.f32 1.0, %v1450_v55 }
 0x112   : > { %v1452_v53 = vpop.eup %1451 }
 0x113   : > { %1457 = vrcp.f32 %v419_v44  ;;  %v425_v6 = vadd.f32 1.0, %v1452_v53  ;;  %v1454_v48 = vpop.eup %1453  ;;  %v1361_v44 = vld [vmem:[%s1591_s22 + $0x8] sm:$0xff] }
 0x114   : > { %v518_v53 = vrot.slane %v1361_v44, %v1859_v60  ;;  %v511_v63 = vcombine.high %v1361_v44, %v1361_v44 }
 0x115   : > { %1459 = vrcp.f32 %v425_v6  ;;  %v1456_v50 = vpop.eup %1455 }
 0x116   : > { %v432_v59 = vadd.f32 1.0, %v1456_v50  ;;  %v526_v62 = vcombine.high %v518_v53, %v518_v53 }
 0x118   : > { %1461 = vrcp.f32 %v432_v59 }
 0x120   : > { %v1458_v52 = vpop.eup %1457 }
 0x121   : > { %v436_v61 = vmul.f32 %v1458_v52, %v1454_v48  ;;  %v525_v52 = vrot.slane %v511_v63, %v1859_v60 }
 0x122   : > { %v1460_v57 = vpop.eup %1459 }
 0x123   : > { %v435_v11 = vmul.f32 %v1460_v57, %v186_v56  ;;  %v527_v59 = vcombine.high %v525_v52, %v525_v52 }
 0x125   : > { %v437_v1 = vadd.f32 %v436_v61, %v435_v11  ;;  %v1462_v2 = vpop.eup %1461 }
 0x127   : > { %1463 = vtanh.f32 %v437_v1  ;;  %440 = vst [vmem:[#allocation4] sm:$0x3] %v437_v1 }
 0x134   : > { %v1464_v55 = vpop.eup %1463 }
 0x135   : > { %v439_v58 = vmul.f32 %v1464_v55, %v1462_v2 }
 0x137   : > { %441 = vst [vmem:[#allocation3] sm:$0x3] %v439_v58 }
 0x13e   : > { %v442_v46 = vld [vmem:[#allocation3] sm:$0x3] }
 0x13f   : > { %597 = vmatmul.mubr.f32.vlgmr.msra.gmra.mxu0 %v442_v46  ;;  %668 = vmatmul.mubr.f32.vlgmr.msra.gmra.mxu1 %v442_v46 }
 0x140   : > { %791 = vmatpush1.msra.mxu0 %v1599_v3  ;;  %862 = vmatpush1.msra.mxu1 %v1626_v13  ;;  %v2090_v3 = vld [vmem:[#allocation19_spill] sm:$0xff] }
 0x141   : > { %792 = vmatprep.subr.mxu0 %v1601_v4  ;;  %863 = vmatprep.subr.mxu1 %v1632_v15  ;;  %v2091_v4 = vld [vmem:[#allocation14_spill] sm:$0xff] }
 0x142   : > { %793 = vmatpush1.msra.mxu0 %v1604_v5  ;;  %864 = vmatpush1.msra.mxu1 %v1634_v16  ;;  %v2092_v5 = vld [vmem:[#allocation21_spill] sm:$0xff] }
 0x143   : > { %794 = vmatprep.subr.mxu0 %v1608_v7  ;;  %865 = vmatprep.subr.mxu1 %v1640_v18  ;;  %v2093_v7 = vld [vmem:[#allocation15_spill] sm:$0xff] }
 0x144   : > { %795 = vmatpush1.msra.mxu0 %v1612_v8  ;;  %866 = vmatpush1.msra.mxu1 %v1646_v20  ;;  %v2094_v8 = vld [vmem:[#allocation23_spill] sm:$0xff] }
 0x145   : > { %796 = vmatprep.subr.mxu0 %v1615_v9  ;;  %867 = vmatprep.subr.mxu1 %v1648_v21  ;;  %v2095_v9 = vld [vmem:[#allocation16_spill] sm:$0xff] }
 0x146   : > { %797 = vmatpush1.msra.mxu0 %v1618_v10  ;;  %868 = vmatpush1.msra.mxu1 %v1654_v23  ;;  %v2096_v10 = vld [vmem:[#allocation25_spill] sm:$0xff] }
 0x147   : > { %798 = vmatprep.subr.mxu0 %v1623_v12  ;;  %869 = vmatprep.subr.mxu1 %v1660_v25  ;;  %v2097_v12 = vld [vmem:[#allocation17_spill] sm:$0xff] }
 0x148   : > { %799 = vmatpush1.msra.mxu0 %v1629_v14  ;;  %870 = vmatpush1.msra.mxu1 %v1666_v27  ;;  %v2098_v14 = vld [vmem:[#allocation27_spill] sm:$0xff] }
 0x149   : > { %800 = vmatprep.subr.mxu0 %v1637_v17  ;;  %871 = vmatprep.subr.mxu1 %v1672_v29  ;;  %v2099_v17 = vld [vmem:[#allocation18_spill] sm:$0xff] }
 0x14a   : > { %801 = vmatpush1.msra.mxu0 %v1643_v19  ;;  %872 = vmatpush1.msra.mxu1 %v1678_v31  ;;  %v2100_v19 = vld [vmem:[#allocation28_spill] sm:$0xff] }
 0x14b   : > { %802 = vmatprep.subr.mxu0 %v1651_v22  ;;  %873 = vmatprep.subr.mxu1 %v1684_v33  ;;  %v2101_v22 = vld [vmem:[#allocation20_spill] sm:$0xff] }
 0x14c   : > { %803 = vmatpush1.msra.mxu0 %v1657_v24  ;;  %874 = vmatpush1.msra.mxu1 %v1690_v35  ;;  %v2102_v24 = vld [vmem:[#allocation29_spill] sm:$0xff] }
 0x14d   : > { %804 = vmatprep.subr.mxu0 %v1663_v26  ;;  %875 = vmatprep.subr.mxu1 %v1696_v37  ;;  %v2103_v26 = vld [vmem:[#allocation22_spill] sm:$0xff] }
 0x14e   : > { %805 = vmatpush1.msra.mxu0 %v1669_v28  ;;  %876 = vmatpush1.msra.mxu1 %v1702_v39  ;;  %v2104_v28 = vld [vmem:[#allocation30_spill] sm:$0xff] }
 0x14f   : > { %806 = vmatprep.subr.mxu0 %v1675_v30  ;;  %877 = vmatprep.subr.mxu1 %v1708_v41  ;;  %v2105_v30 = vld [vmem:[#allocation24_spill] sm:$0xff] }
 0x150   : > { %807 = vmatpush1.msra.mxu0 %v1681_v32  ;;  %878 = vmatpush1.msra.mxu1 %v1714_v43  ;;  %v2106_v32 = vld [vmem:[#allocation31_spill] sm:$0xff] }
 0x151   : > { %808 = vmatprep.subr.mxu0 %v1687_v34  ;;  %879 = vmatprep.subr.mxu1 %v1720_v45  ;;  %v2107_v34 = vld [vmem:[#allocation26_spill] sm:$0xff] }
 0x152   : > { %809 = vmatpush1.msra.mxu0 %v1693_v36  ;;  %880 = vmatpush1.msra.mxu1 %v1726_v47  ;;  %v2108_v36 = vmov 0.0  }
 0x153   : > { %810 = vmatprep.subr.mxu0 %v1699_v38  ;;  %881 = vmatprep.subr.mxu1 %v1732_v49  ;;  %v2109_v38 = vld [vmem:[#allocation32_spill] sm:$0xff] }
 0x154   : > { %811 = vmatpush1.msra.mxu0 %v1705_v40  ;;  %882 = vmatpush1.msra.mxu1 %v1738_v51  ;;  %v2110_v40 = vld [vmem:[#allocation12_spill] sm:$0xff] }
 0x155   : > { %812 = vmatprep.subr.mxu0 %v1711_v42  ;;  %883 = vmatprep.subr.mxu1 %v2090_v3  ;;  %v2111_v42 = vld [vmem:[#allocation13_spill] sm:$0xff] }
 0x156   : > { %813 = vmatpush1.msra.mxu0 %v2091_v4  ;;  %884 = vmatpush1.msra.mxu1 %v2092_v5 }
 0x157   : > { %814 = vmatprep.subr.mxu0 %v2093_v7  ;;  %885 = vmatprep.subr.mxu1 %v2094_v8 }
 0x158   : > { %815 = vmatpush1.msra.mxu0 %v2095_v9  ;;  %886 = vmatpush1.msra.mxu1 %v2096_v10 }
 0x159   : > { %816 = vmatprep.subr.mxu0 %v2097_v12  ;;  %887 = vmatprep.subr.mxu1 %v2098_v14 }
 0x15a   : > { %817 = vmatpush1.msra.mxu0 %v2099_v17  ;;  %888 = vmatpush1.msra.mxu1 %v2100_v19 }
 0x15b   : > { %818 = vmatprep.subr.mxu0 %v2101_v22  ;;  %889 = vmatprep.subr.mxu1 %v2102_v24  ;;  %v443_v22 = vld [vmem:[#allocation4] sm:$0x3] }
 0x15c   : > { %819 = vmatpush1.msra.mxu0 %v2103_v26  ;;  %890 = vmatpush1.msra.mxu1 %v2104_v28 }
 0x15d   : > { %820 = vmatprep.subr.mxu0 %v2105_v30  ;;  %891 = vmatprep.subr.mxu1 %v2106_v32 }
 0x15e   : > { %821 = vmatpush1.msra.mxu0 %v2107_v34  ;;  %854 = vmatprep.mubr.f32.mxu0 %v2108_v36 }
 0x15f   : > { %892 = vmatpush1.msra.mxu1 %v2109_v38  ;;  %925 = vmatprep.mubr.f32.mxu1 %v2108_v36 }
 0x160   : > { %1048 = vmatprep.subr.mxu0 %v2110_v40  ;;  %1119 = vmatprep.subr.mxu1 %v2111_v42 }
 0x1ff   : > { %v598_v54 = vpop.f32.mrf.mxu0  ;;  %v669_v56 = vpop.f32.mrf.mxu1 }
 0x200   : > { %v599_v0 = vadd.f32 %v598_v54, %v518_v53  ;;  %v670_v55 = vadd.f32 %v669_v56, %v525_v52 }
 0x201   : > { %v600_v6 = vpop.f32.mrf.mxu0  ;;  %v671_v11 = vpop.f32.mrf.mxu1 }
 0x202   : > { %v1362_v48 = vmul.f32 -1.442695, %v599_v0  ;;  %v601_v50 = vadd.f32 %v600_v6, %v526_v62  ;;  %v672_v61 = vadd.f32 %v671_v11, %v527_v59 }
 0x204   : > { %1465 = vpow2.f32 %v1362_v48  ;;  %v1363_v57 = vmul.f32 -1.442695, %v601_v50  ;;  %v1364_v1 = vmul.f32 -1.442695, %v672_v61 }
 0x206   : > { %1467 = vpow2.f32 %v1363_v57 }
 0x207   : > { %1469 = vpow2.f32 %v1364_v1 }
 0x211   : > { %v1466_v2 = vpop.eup %1465 }
 0x212   : > { %v677_v58 = vadd.f32 1.0, %v1466_v2 }
 0x213   : > { %v1468_v46 = vpop.eup %1467 }
 0x214   : > { %1471 = vrcp.f32 %v677_v58  ;;  %v683_v4 = vadd.f32 1.0, %v1468_v46  ;;  %v1470_v7 = vpop.eup %1469 }
 0x215   : > { %1473 = vtanh.f32 %v670_v55  ;;  %v690_v26 = vadd.f32 1.0, %v1470_v7 }
 0x216   : > { %1475 = vrcp.f32 %v683_v4 }
 0x217   : > { %1477 = vrcp.f32 %v690_v26 }
 0x221   : > { %v1472_v9 = vpop.eup %1471 }
 0x222   : > { %v1474_v12 = vpop.eup %1473 }
 0x223   : > { %v1476_v17 = vpop.eup %1475  ;;  %v694_v30 = vmul.f32 %v1474_v12, %v1472_v9 }
 0x224   : > { %v693_v34 = vmul.f32 %v1476_v17, %v443_v22  ;;  %v1478_v42 = vpop.eup %1477 }
 0x226   : > { %v695_v40 = vadd.f32 %v694_v30, %v693_v34 }
 0x228   : > { %1479 = vtanh.f32 %v695_v40  ;;  %698 = vst [vmem:[#allocation4] sm:$0x3] %v695_v40 }
 0x22f   : > { %v701_v30 = vld [vmem:[#allocation4] sm:$0x3] }
 0x235   : > { %v1480_v44 = vpop.eup %1479 }
 0x236   : > { %v697_v53 = vmul.f32 %v1480_v44, %v1478_v42 }
 0x238   : > { %699 = vst [vmem:[#allocation3] sm:$0x3] %v697_v53 }
 0x23f   : > { %v700_v62 = vld [vmem:[#allocation3] sm:$0x3] }
 0x240   : > { %855 = vmatmul.mubr.f32.vlgmr.msra.gmra.mxu0 %v700_v62  ;;  %926 = vmatmul.mubr.f32.vlgmr.msra.gmra.mxu1 %v700_v62 }
 0x241   : > { %1120 = vmatpush1.msra.mxu1 %v1626_v13  ;;  %1112 = vmatprep.mubr.f32.mxu0 %v2108_v36  ;;  %v1020_v13 = vld [vmem:[#allocation2 + $0x1e0] sm:$0xff] }
 0x242   : > { %1121 = vmatprep.subr.mxu1 %v1632_v15  ;;  %1183 = vmatprep.mubr.f32.mxu1 %v2108_v36  ;;  %v1017_v15 = vld [vmem:[#allocation2 + $0x1c8] sm:$0xff]  ;;  %v960_v36 = vld [vmem:[#allocation2] sm:$0xff] }
 0x243   : > { %1122 = vmatpush1.msra.mxu1 %v1634_v16  ;;  %1049 = vmatpush1.msra.mxu0 %v1020_v13  ;;  %v1016_v16 = vld [vmem:[#allocation2 + $0x1c0] sm:$0xff] }
 0x244   : > { %1123 = vmatprep.subr.mxu1 %v1640_v18  ;;  %1050 = vmatprep.subr.mxu0 %v1017_v15  ;;  %v1013_v18 = vld [vmem:[#allocation2 + $0x1a8] sm:$0xff] }
 0x245   : > { %1124 = vmatpush1.msra.mxu1 %v1646_v20  ;;  %1051 = vmatpush1.msra.mxu0 %v1016_v16  ;;  %v1012_v20 = vld [vmem:[#allocation2 + $0x1a0] sm:$0xff]  ;;  %v1369_v16 = vld [vmem:[%s1591_s22 + $0x18] sm:$0xff] }
 0x246   : > { %1125 = vmatprep.subr.mxu1 %v1648_v21  ;;  %1052 = vmatprep.subr.mxu0 %v1013_v18  ;;  %v1009_v21 = vld [vmem:[#allocation2 + $0x188] sm:$0xff]  ;;  %v1034_v18 = vrot.slane %v1369_v16, %v1859_v60 }
 0x247   : > { %1126 = vmatpush1.msra.mxu1 %v1654_v23  ;;  %1053 = vmatpush1.msra.mxu0 %v1012_v20  ;;  %v1008_v23 = vld [vmem:[#allocation2 + $0x180] sm:$0xff] }
 0x248   : > { %1127 = vmatprep.subr.mxu1 %v1660_v25  ;;  %1054 = vmatprep.subr.mxu0 %v1009_v21  ;;  %v1005_v25 = vld [vmem:[#allocation2 + $0x168] sm:$0xff]  ;;  %v1042_v20 = vcombine.high %v1034_v18, %v1034_v18 }
 0x249   : > { %1128 = vmatpush1.msra.mxu1 %v1666_v27  ;;  %1055 = vmatpush1.msra.mxu0 %v1008_v23  ;;  %v1004_v27 = vld [vmem:[#allocation2 + $0x160] sm:$0xff]  ;;  %v1027_v23 = vcombine.high %v1369_v16, %v1369_v16 }
 0x24a   : > { %1129 = vmatprep.subr.mxu1 %v1672_v29  ;;  %1056 = vmatprep.subr.mxu0 %v1005_v25  ;;  %v1001_v29 = vld [vmem:[#allocation2 + $0x148] sm:$0xff] }
 0x24b   : > { %1130 = vmatpush1.msra.mxu1 %v1678_v31  ;;  %1057 = vmatpush1.msra.mxu0 %v1004_v27  ;;  %v1000_v31 = vld [vmem:[#allocation2 + $0x140] sm:$0xff] }
 0x24c   : > { %1131 = vmatprep.subr.mxu1 %v1684_v33  ;;  %1058 = vmatprep.subr.mxu0 %v1001_v29  ;;  %v997_v33 = vld [vmem:[#allocation2 + $0x128] sm:$0xff] }
 0x24d   : > { %1132 = vmatpush1.msra.mxu1 %v1690_v35  ;;  %1059 = vmatpush1.msra.mxu0 %v1000_v31  ;;  %v996_v35 = vld [vmem:[#allocation2 + $0x120] sm:$0xff] }
 0x24e   : > { %1133 = vmatprep.subr.mxu1 %v1696_v37  ;;  %1060 = vmatprep.subr.mxu0 %v997_v33  ;;  %v993_v37 = vld [vmem:[#allocation2 + $0x108] sm:$0xff]  ;;  %v1041_v33 = vrot.slane %v1027_v23, %v1859_v60 }
 0x24f   : > { %1134 = vmatpush1.msra.mxu1 %v1702_v39  ;;  %1061 = vmatpush1.msra.mxu0 %v996_v35  ;;  %v992_v39 = vld [vmem:[#allocation2 + $0x100] sm:$0xff] }
 0x250   : > { %1135 = vmatprep.subr.mxu1 %v1708_v41  ;;  %1062 = vmatprep.subr.mxu0 %v993_v37  ;;  %v989_v41 = vld [vmem:[#allocation2 + $0xe8] sm:$0xff] }
 0x251   : > { %1136 = vmatpush1.msra.mxu1 %v1714_v43  ;;  %1063 = vmatpush1.msra.mxu0 %v992_v39  ;;  %v988_v43 = vld [vmem:[#allocation2 + $0xe0] sm:$0xff]  ;;  %v1043_v39 = vcombine.high %v1041_v33, %v1041_v33 }
 0x252   : > { %1137 = vmatprep.subr.mxu1 %v1720_v45  ;;  %1064 = vmatprep.subr.mxu0 %v989_v41  ;;  %v985_v45 = vld [vmem:[#allocation2 + $0xc8] sm:$0xff] }
 0x253   : > { %1138 = vmatpush1.msra.mxu1 %v1726_v47  ;;  %1065 = vmatpush1.msra.mxu0 %v988_v43  ;;  %v984_v47 = vld [vmem:[#allocation2 + $0xc0] sm:$0xff] }
 0x254   : > { %1139 = vmatprep.subr.mxu1 %v1732_v49  ;;  %1066 = vmatprep.subr.mxu0 %v985_v45  ;;  %v981_v49 = vld [vmem:[#allocation2 + $0xa8] sm:$0xff] }
 0x255   : > { %1140 = vmatpush1.msra.mxu1 %v1738_v51  ;;  %1067 = vmatpush1.msra.mxu0 %v984_v47  ;;  %v980_v51 = vld [vmem:[#allocation2 + $0xa0] sm:$0xff] }
 0x256   : > { %1141 = vmatprep.subr.mxu1 %v2090_v3  ;;  %1068 = vmatprep.subr.mxu0 %v981_v49  ;;  %v977_v3 = vld [vmem:[#allocation2 + $0x88] sm:$0xff] }
 0x257   : > { %1142 = vmatpush1.msra.mxu1 %v2092_v5  ;;  %1069 = vmatpush1.msra.mxu0 %v980_v51  ;;  %v976_v5 = vld [vmem:[#allocation2 + $0x80] sm:$0xff] }
 0x258   : > { %1143 = vmatprep.subr.mxu1 %v2094_v8  ;;  %1070 = vmatprep.subr.mxu0 %v977_v3  ;;  %v973_v8 = vld [vmem:[#allocation2 + $0x68] sm:$0xff] }
 0x259   : > { %1144 = vmatpush1.msra.mxu1 %v2096_v10  ;;  %1071 = vmatpush1.msra.mxu0 %v976_v5  ;;  %v972_v10 = vld [vmem:[#allocation2 + $0x60] sm:$0xff] }
 0x25a   : > { %1145 = vmatprep.subr.mxu1 %v2098_v14  ;;  %v969_v14 = vld [vmem:[#allocation2 + $0x48] sm:$0xff]  ;;  %1072 = vmatprep.subr.mxu0 %v973_v8 }
 0x25b   : > { %1146 = vmatpush1.msra.mxu1 %v2100_v19  ;;  %v968_v19 = vld [vmem:[#allocation2 + $0x40] sm:$0xff]  ;;  %1073 = vmatpush1.msra.mxu0 %v972_v10 }
 0x25c   : > { %1147 = vmatprep.subr.mxu1 %v2102_v24  ;;  %v965_v24 = vld [vmem:[#allocation2 + $0x28] sm:$0xff]  ;;  %1074 = vmatprep.subr.mxu0 %v969_v14 }
 0x25d   : > { %1148 = vmatpush1.msra.mxu1 %v2104_v28  ;;  %v964_v28 = vld [vmem:[#allocation2 + $0x20] sm:$0xff]  ;;  %1075 = vmatpush1.msra.mxu0 %v968_v19 }
 0x25e   : > { %1149 = vmatprep.subr.mxu1 %v2106_v32  ;;  %v961_v32 = vld [vmem:[#allocation2 + $0x8] sm:$0xff]  ;;  %1076 = vmatprep.subr.mxu0 %v965_v24 }
 0x25f   : > { %1150 = vmatpush1.msra.mxu1 %v2109_v38  ;;  %1077 = vmatpush1.msra.mxu0 %v964_v28  ;;  %v1365_v38 = vld [vmem:[%s1591_s22 + $0x10] sm:$0xff] }
 0x260   : > { %1078 = vmatprep.subr.mxu0 %v961_v32  ;;  %v776_v54 = vrot.slane %v1365_v38, %v1859_v60  ;;  %v769_v6 = vcombine.high %v1365_v38, %v1365_v38 }
 0x261   : > { %1079 = vmatpush1.msra.mxu0 %v960_v36 }
 0x262   : > { %v784_v63 = vcombine.high %v776_v54, %v776_v54  ;;  %v783_v57 = vrot.slane %v769_v6, %v1859_v60 }
 0x264   : > { %v785_v61 = vcombine.high %v783_v57, %v783_v57 }
 0x300   : > { %v856_v0 = vpop.f32.mrf.mxu0  ;;  %v927_v59 = vpop.f32.mrf.mxu1 }
 0x301   : > { %v857_v48 = vadd.f32 %v856_v0, %v776_v54  ;;  %v928_v46 = vadd.f32 %v927_v59, %v783_v57 }
 0x302   : > { %v858_v50 = vpop.f32.mrf.mxu0  ;;  %v929_v1 = vpop.f32.mrf.mxu1 }
 0x303   : > { %v1366_v52 = vmul.f32 -1.442695, %v857_v48  ;;  %v859_v56 = vadd.f32 %v858_v50, %v784_v63  ;;  %v930_v2 = vadd.f32 %v929_v1, %v785_v61 }
 0x305   : > { %1481 = vpow2.f32 %v1366_v52  ;;  %v1367_v11 = vmul.f32 -1.442695, %v859_v56  ;;  %v1368_v55 = vmul.f32 -1.442695, %v930_v2 }
 0x307   : > { %1483 = vpow2.f32 %v1367_v11 }
 0x308   : > { %1485 = vpow2.f32 %v1368_v55 }
 0x312   : > { %v1482_v58 = vpop.eup %1481 }
 0x313   : > { %v935_v4 = vadd.f32 1.0, %v1482_v58 }
 0x314   : > { %v1484_v7 = vpop.eup %1483 }
 0x315   : > { %1487 = vrcp.f32 %v935_v4  ;;  %v941_v9 = vadd.f32 1.0, %v1484_v7  ;;  %v1486_v12 = vpop.eup %1485 }
 0x316   : > { %1489 = vtanh.f32 %v928_v46  ;;  %v948_v34 = vadd.f32 1.0, %v1486_v12 }
 0x317   : > { %1491 = vrcp.f32 %v941_v9 }
 0x318   : > { %1493 = vrcp.f32 %v948_v34 }
 0x322   : > { %v1488_v17 = vpop.eup %1487 }
 0x323   : > { %v1490_v22 = vpop.eup %1489 }
 0x324   : > { %v1492_v26 = vpop.eup %1491  ;;  %v952_v40 = vmul.f32 %v1490_v22, %v1488_v17 }
 0x325   : > { %v951_v42 = vmul.f32 %v1492_v26, %v701_v30  ;;  %v1494_v53 = vpop.eup %1493 }
 0x327   : > { %v953_v44 = vadd.f32 %v952_v40, %v951_v42 }
 0x329   : > { %1495 = vtanh.f32 %v953_v44  ;;  %956 = vst [vmem:[#allocation4] sm:$0x3] %v953_v44 }
 0x330   : > { %v959_v19 = vld [vmem:[#allocation4] sm:$0x3] }
 0x336   : > { %v1496_v62 = vpop.eup %1495 }
 0x337   : > { %v955_v13 = vmul.f32 %v1496_v62, %v1494_v53 }
 0x339   : > { %957 = vst [vmem:[#allocation3] sm:$0x3] %v955_v13 }
 0x340   : > { %v958_v15 = vld [vmem:[#allocation3] sm:$0x3] }
 0x341   : > { %1113 = vmatmul.mubr.f32.vlgmr.msra.gmra.mxu0 %v958_v15  ;;  %1184 = vmatmul.mubr.f32.vlgmr.msra.gmra.mxu1 %v958_v15 }
 0x401   : > { %v1114_v21 = vpop.f32.mrf.mxu0  ;;  %v1185_v35 = vpop.f32.mrf.mxu1 }
 0x402   : > { %v1115_v25 = vadd.f32 %v1114_v21, %v1034_v18  ;;  %v1186_v49 = vadd.f32 %v1185_v35, %v1041_v33 }
 0x403   : > { %v1116_v27 = vpop.f32.mrf.mxu0  ;;  %v1187_v41 = vpop.f32.mrf.mxu1 }
 0x404   : > { %v1370_v29 = vmul.f32 -1.442695, %v1115_v25  ;;  %v1117_v31 = vadd.f32 %v1116_v27, %v1042_v20  ;;  %v1188_v43 = vadd.f32 %v1187_v41, %v1043_v39 }
 0x406   : > { %1497 = vpow2.f32 %v1370_v29  ;;  %v1371_v37 = vmul.f32 -1.442695, %v1117_v31  ;;  %v1372_v45 = vmul.f32 -1.442695, %v1188_v43 }
 0x408   : > { %1499 = vpow2.f32 %v1371_v37 }
 0x409   : > { %1501 = vpow2.f32 %v1372_v45 }
 0x413   : > { %v1498_v47 = vpop.eup %1497 }
 0x414   : > { %v1193_v51 = vadd.f32 1.0, %v1498_v47 }
 0x415   : > { %v1500_v3 = vpop.eup %1499 }
 0x416   : > { %1503 = vrcp.f32 %v1193_v51  ;;  %v1199_v5 = vadd.f32 1.0, %v1500_v3  ;;  %v1502_v8 = vpop.eup %1501 }
 0x417   : > { %1505 = vtanh.f32 %v1186_v49  ;;  %v1206_v24 = vadd.f32 1.0, %v1502_v8 }
 0x418   : > { %1507 = vrcp.f32 %v1199_v5 }
 0x419   : > { %1509 = vrcp.f32 %v1206_v24 }
 0x423   : > { %v1504_v10 = vpop.eup %1503 }
 0x424   : > { %v1506_v60 = vpop.eup %1505 }
 0x425   : > { %v1508_v14 = vpop.eup %1507  ;;  %v1210_v28 = vmul.f32 %v1506_v60, %v1504_v10 }
 0x426   : > { %v1209_v32 = vmul.f32 %v1508_v14, %v959_v19  ;;  %v1510_v38 = vpop.eup %1509 }
 0x428   : > { %v1211_v36 = vadd.f32 %v1210_v28, %v1209_v32 }
 0x42a   : > { %1511 = vtanh.f32 %v1211_v36  ;;  %1214 = vst [vmem:[#allocation4] sm:$0x3] %v1211_v36 }
 0x436   : > { %1219 = sbr.rel (%p1373_p10) target bundleno = 1312 (0x520), region = 44 }
 0x437   : > { %v1512_v54 = vpop.eup %1511 }
 0x438   : > { %v1213_v63 = vmul.f32 %v1512_v54, %v1510_v38 }
 0x43a   : > { %1215 = vst [vmem:[#allocation3] sm:$0x3] %v1213_v63 }
 0x43b   : > { %v1236_v0 = vld [vmem:[%s2029_s2 + $0x78] sm:$0xff]  ;;  %v1547_v6 = vmov 0.0   ;;  %v1235_v48 = vld [vmem:[%s2029_s2 + $0x70] sm:$0xff]  ;;  %vm1548_vm0 = vmmov 0   ;;  %v1234_v50 = vld [vmem:[%s2029_s2 + $0x68] sm:$0xff]  ;;  %vm1314_vm1 = vcmask 1024  }
 0x43c   : > { %1396 = vmatprep.subr.mxu0 %v1547_v6  ;;  %1428 = vmatprep.mubr.msk.f32.mxu0 %vm1548_vm0, %v1547_v6  ;;  %v1233_v52 = vld [vmem:[%s2029_s2 + $0x60] sm:$0xff]  ;;  %v1232_v56 = vld [vmem:[%s2029_s2 + $0x58] sm:$0xff]  ;;  %v1231_v57 = vld [vmem:[%s2029_s2 + $0x50] sm:$0xff] }
 0x43d   : > { %1397 = vmatpush3.msra.mxu0 %v1236_v0  ;;  %v1230_v59 = vld [vmem:[%s2029_s2 + $0x48] sm:$0xff]  ;;  %v1229_v11 = vld [vmem:[%s2029_s2 + $0x40] sm:$0xff]  ;;  %v1228_v61 = vld [vmem:[%s2029_s2 + $0x38] sm:$0xff] }
 0x43e   : > { %1398 = vmatprep.subr.mxu0 %v1547_v6  ;;  %v1227_v1 = vld [vmem:[%s2029_s2 + $0x30] sm:$0xff]  ;;  %v1226_v2 = vld [vmem:[%s2029_s2 + $0x28] sm:$0xff]  ;;  %v1225_v55 = vld [vmem:[%s2029_s2 + $0x20] sm:$0xff] }
 0x43f   : > { %1399 = vmatpush3.msra.mxu0 %v1235_v48  ;;  %v1224_v58 = vld [vmem:[%s2029_s2 + $0x18] sm:$0xff]  ;;  %v1223_v46 = vld [vmem:[%s2029_s2 + $0x10] sm:$0xff]  ;;  %v1222_v4 = vld [vmem:[%s2029_s2 + $0x8] sm:$0xff] }
 0x440   : > { %1400 = vmatprep.subr.mxu0 %v1547_v6  ;;  %v1221_v7 = vld [vmem:[%s2029_s2] sm:$0xff] }
 0x441   : > { %1401 = vmatpush3.msra.mxu0 %v1234_v50  ;;  %v1220_v9 = vld [vmem:[#allocation3] sm:$0x3]  ;;  %v1374_v12 = vld [vmem:[#allocation6] ss:$0 sm:$0xff] }
 0x442   : > { %1402 = vmatprep.subr.mxu0 %v1547_v6 }
 0x443   : > { %1403 = vmatpush3.msra.mxu0 %v1233_v52 }
 0x444   : > { %1404 = vmatprep.subr.mxu0 %v1547_v6 }
 0x445   : > { %1405 = vmatpush3.msra.mxu0 %v1232_v56 }
 0x446   : > { %1406 = vmatprep.subr.mxu0 %v1547_v6 }
 0x447   : > { %1407 = vmatpush3.msra.mxu0 %v1231_v57 }
 0x448   : > { %1408 = vmatprep.subr.mxu0 %v1547_v6 }
 0x449   : > { %1409 = vmatpush3.msra.mxu0 %v1230_v59 }
 0x44a   : > { %1410 = vmatprep.subr.mxu0 %v1547_v6 }
 0x44b   : > { %1411 = vmatpush3.msra.mxu0 %v1229_v11 }
 0x44c   : > { %1412 = vmatprep.subr.mxu0 %v1547_v6 }
 0x44d   : > { %1413 = vmatpush3.msra.mxu0 %v1228_v61 }
 0x44e   : > { %1414 = vmatprep.subr.mxu0 %v1547_v6 }
 0x44f   : > { %1415 = vmatpush3.msra.mxu0 %v1227_v1 }
 0x450   : > { %1416 = vmatprep.subr.mxu0 %v1547_v6 }
 0x451   : > { %1417 = vmatpush3.msra.mxu0 %v1226_v2 }
 0x452   : > { %1418 = vmatprep.subr.mxu0 %v1547_v6 }
 0x453   : > { %1419 = vmatpush3.msra.mxu0 %v1225_v55 }
 0x454   : > { %1420 = vmatprep.subr.mxu0 %v1547_v6 }
 0x455   : > { %1421 = vmatpush3.msra.mxu0 %v1224_v58 }
 0x456   : > { %1422 = vmatprep.subr.mxu0 %v1547_v6 }
 0x457   : > { %1423 = vmatpush3.msra.mxu0 %v1223_v46 }
 0x458   : > { %1424 = vmatprep.subr.mxu0 %v1547_v6 }
 0x459   : > { %1425 = vmatpush3.msra.mxu0 %v1222_v4 }
 0x45a   : > { %1426 = vmatprep.subr.mxu0 %v1547_v6 }
 0x45b   : > { %1427 = vmatpush3.msra.mxu0 %v1221_v7 }
 0x45c   : > { %1429 = vmatmul.mubr.f32.vlgmr.msra.gmra.mxu0 %v1220_v9 }
 0x51c   : > { %v1310_v17 = vpop.f32.mrf.mxu0 }
 0x51d   : > { %v1311_v22 = vadd.f32 %v1374_v12, %v1310_v17 }
 0x51e   : > { %v1430_v26 = vpop.f32.mrf.mxu0 }
 0x51f   : > { %1315 = vst.msk [vmem:[%s2031_s4] sm:$0x3] %vm1314_vm1, %v1311_v22 }
 0x520 PF: > { %s16_s17 = sadd.s32 1, %s1541_s17  }
 0x521   : > { %p13_p11 = scmp.ge.s32.totalorder %s16_s17, 4  }
 0x523   :  { %15 = sbr.rel (!%p13_p11) target bundleno = 3 (0x3), region = 73 }
 0x528   :  { %1327 = vsyncmov [#allocation5] }
 0x52b   :  { %s1328_s10 = vpop.sfrf %1327 }
 0x52c   :  { %p1377_p12 = scmp.ne.s32.totalorder %s1328_s10, 0 }
 0x52e   :  { %1332 = shalt.err (%p1377_p12)  }

</bundles_post_ra>
